<compile_context>
chip_gen: v5e
topology: v5e:2x2
jax: 0.10.0
libtpu: 0.0.40
codegen_flags: <defaults>
</compile_context>

<pallas_src>
import jax
import jax.numpy as jnp
from jax.experimental import pallas as pl
from jax.experimental.pallas import tpu as pltpu


def _norm_kernel(scale_ref, bias_ref, x_ref, o_ref):
    # scale_ref / bias_ref: VMEM (block_r, 1) per-row fused params.
    # x_ref / o_ref:        VMEM (block_r, block_hw) dense tile.
    s = scale_ref[...]                       # (block_r, 1) f32
    b = bias_ref[...]                        # (block_r, 1) f32
    x = x_ref[...].astype(jnp.float32)       # f32 math (v5e VPU has no bf16 ALU)
    o_ref[...] = (x * s + b).astype(o_ref.dtype)


def _round_up(x, m):
    return -(-x // m) * m


def _choose_blocks(rows, hw, itemsize, target_bytes=4 << 20):
    """Pick a (block_r, block_hw) tile: sublane-dense rows, ~target_bytes lane blocks."""
    sub = max(8, 32 // itemsize)          # sublane packing: 8 f32, 16 bf16, 32 int8

    # Row (sublane) block: full extent when modest, else a multiple of `sub`.
    if rows <= 256:
        block_r = rows                    # block dim == full array dim is always legal
    else:
        block_r = 256                     # multiple of 8/16/32; ragged tail via cdiv grid
    padded_r = _round_up(block_r, sub)

    # Lane block: multiple of 128 sized toward target_bytes (or full extent if < 128).
    if hw <= 128:
        block_hw = hw
    else:
        max_lanes = max(128, (target_bytes // max(1, padded_r * itemsize)) // 128 * 128)
        full_128 = hw if hw % 128 == 0 else (hw // 128) * 128
        block_hw = min(full_128, max_lanes)

    # Ensure >= 2 grid steps when possible so v7x's two TCs both get work.
    grid_r = -(-rows // block_r)
    grid_hw = -(-hw // block_hw)
    if grid_r * grid_hw < 2:
        if block_hw > 128:
            block_hw = max(128, _round_up(-(-block_hw // 2), 128))
        elif block_r > sub:
            block_r = _round_up(-(-block_r // 2), sub)

    return block_r, block_hw


def normalization(x, mean, std):
    """Pallas equivalent of Normalization.forward: (x - mean) / std.

    x:    (N, C, H, W) float array (NCHW, matching PyTorch conv layout)
    mean: (C,) / (C, 1, 1) per-channel mean
    std:  (C,) / (C, 1, 1) per-channel std
    """
    N, C, H, W = x.shape
    HW = H * W
    rows = N * C
    itemsize = jnp.dtype(x.dtype).itemsize

    mean_f = jnp.asarray(mean, dtype=jnp.float32).reshape(C)
    std_f = jnp.asarray(std, dtype=jnp.float32).reshape(C)
    inv_std = 1.0 / std_f
    # Fused per-row params, replicated across the batch: out = x * scale + bias.
    scale = jnp.broadcast_to(inv_std[None, :], (N, C)).reshape(rows, 1)
    bias = jnp.broadcast_to((-mean_f * inv_std)[None, :], (N, C)).reshape(rows, 1)

    # Dense 2D view: rows (N*C) map to sublanes, H*W maps to lanes.
    x_flat = x.reshape(rows, HW)

    block_r, block_hw = _choose_blocks(rows, HW, itemsize)
    grid = (pl.cdiv(rows, block_r), pl.cdiv(HW, block_hw))

    # 2 double-buffered blocks each for input and output (+ params, + headroom),
    # computed from the padded footprint and capped below v7x's 64 MiB VMEM.
    sub = max(8, 32 // itemsize)
    padded_block_bytes = _round_up(block_r, sub) * _round_up(block_hw, 128) * itemsize
    vmem_limit = int(min(48 << 20, max(16 << 20, 6 * padded_block_bytes)))

    out_flat = pl.pallas_call(
        _norm_kernel,
        out_shape=jax.ShapeDtypeStruct((rows, HW), x.dtype),
        grid=grid,
        in_specs=[
            pl.BlockSpec((block_r, 1), lambda r, hw: (r, 0)),          # scale
            pl.BlockSpec((block_r, 1), lambda r, hw: (r, 0)),          # bias
            pl.BlockSpec((block_r, block_hw), lambda r, hw: (r, hw)),  # x tile
        ],
        out_specs=pl.BlockSpec((block_r, block_hw), lambda r, hw: (r, hw)),
        compiler_params=pltpu.CompilerParams(
            dimension_semantics=("parallel", "parallel"),
            vmem_limit_bytes=vmem_limit,
        ),
    )(scale, bias, x_flat)

    return out_flat.reshape(N, C, H, W)


if __name__ == "__main__":
    key = jax.random.PRNGKey(0)
    N, C, H, W = 2, 4, 16, 16

    x = jax.random.normal(key, (N, C, H, W), dtype=jnp.float32)
    # Deterministic "ImageNet-style" per-channel stats, extended to C=4.
    mean = jnp.array([0.485, 0.456, 0.406, 0.5], dtype=jnp.float32)
    std = jnp.array([0.229, 0.224, 0.225, 0.25], dtype=jnp.float32)

    out = normalization(x, mean, std)
    out = jax.block_until_ready(out)

    # Reference in plain JAX (mirrors PyTorch broadcasting of (C,1,1) params).
    ref = (x - mean[None, :, None, None]) / std[None, :, None, None]
    assert out.shape == x.shape and out.dtype == x.dtype
    # Fused multiply-by-reciprocal differs from true division by ~1 ulp; keep tolerances.
    assert jnp.allclose(out, ref, rtol=1e-5, atol=1e-5)

    print("KERNEL_OK")
</pallas_src>

<mosaic_0001>
module attributes {stable_mosaic.version = 11 : i64} {
  func.func @_norm_kernel(%arg0: i32, %arg1: i32, %arg2: memref<8x1xf32, #tpu.memory_space<vmem>>, %arg3: memref<8x1xf32, #tpu.memory_space<vmem>>, %arg4: memref<8x128xf32, #tpu.memory_space<vmem>>, %arg5: memref<8x128xf32, #tpu.memory_space<vmem>>) attributes {dimension_semantics = [#tpu.dimension_semantics<parallel>, #tpu.dimension_semantics<parallel>], iteration_bounds = array<i64: 1, 2>, scalar_prefetch = 0 : i64, scratch_operands = 0 : i64, tpu.core_type = #tpu.core_type<tc>, window_params = [{transform_indices = @transform_0, window_bounds = array<i64: 8, 1>}, {transform_indices = @transform_1, window_bounds = array<i64: 8, 1>}, {transform_indices = @transform_2, window_bounds = array<i64: 8, 128>}, {transform_indices = @transform_3, window_bounds = array<i64: 8, 128>}]} {
    %c0 = arith.constant 0 : index
    %c0_0 = arith.constant 0 : index
    %0 = vector.load %arg2[%c0, %c0_0] : memref<8x1xf32, #tpu.memory_space<vmem>>, vector<8x1xf32>
    %c0_1 = arith.constant 0 : index
    %c0_2 = arith.constant 0 : index
    %1 = vector.load %arg3[%c0_1, %c0_2] : memref<8x1xf32, #tpu.memory_space<vmem>>, vector<8x1xf32>
    %c0_3 = arith.constant 0 : index
    %c0_4 = arith.constant 0 : index
    %2 = vector.load %arg4[%c0_3, %c0_4] : memref<8x128xf32, #tpu.memory_space<vmem>>, vector<8x128xf32>
    %3 = vector.broadcast %0 : vector<8x1xf32> to vector<8x128xf32>
    %4 = arith.mulf %2, %3 : vector<8x128xf32>
    %5 = vector.broadcast %1 : vector<8x1xf32> to vector<8x128xf32>
    %6 = arith.addf %4, %5 : vector<8x128xf32>
    %c0_5 = arith.constant 0 : index
    %c0_6 = arith.constant 0 : index
    %7 = vector.load %arg5[%c0_5, %c0_6] : memref<8x128xf32, #tpu.memory_space<vmem>>, vector<8x128xf32>
    tpu.vector_store %arg5[%c0_5, %c0_6], %6 {strides = array<i32>} : memref<8x128xf32, #tpu.memory_space<vmem>>, vector<8x128xf32>,
    return
  }
  func.func @transform_0(%arg0: i32, %arg1: i32) -> (i32, i32) {
    %c0_i32 = arith.constant 0 : i32
    %c0_i32_0 = arith.constant 0 : i32
    return %arg0, %c0_i32 : i32, i32
  }
  func.func @transform_1(%arg0: i32, %arg1: i32) -> (i32, i32) {
    %c0_i32 = arith.constant 0 : i32
    %c0_i32_0 = arith.constant 0 : i32
    return %arg0, %c0_i32 : i32, i32
  }
  func.func @transform_2(%arg0: i32, %arg1: i32) -> (i32, i32) {
    %c0_i32 = arith.constant 0 : i32
    return %arg0, %arg1 : i32, i32
  }
  func.func @transform_3(%arg0: i32, %arg1: i32) -> (i32, i32) {
    %c0_i32 = arith.constant 0 : i32
    return %arg0, %arg1 : i32, i32
  }
}

</mosaic_0001>

<bundles_post_ra>
// kernel: tpu_custom_call.1
= control target key start
LH: loop header
LB: loop body
LE: loop exit
PB: predicated region body
PF: predicated region fallthrough
CT: control target
= control target key end

     0   :  { %8 = vsyncpa [#allocation3], 0  ;;  %s641_s0 = inlined_call_operand.vmem [shape: f32[8,1], index: 0, kind: input, shape index: {}]   ;;  %s642_s1 = inlined_call_operand.vmem [shape: f32[8,1], index: 1, kind: input, shape index: {}]   ;;  %s643_s2 = inlined_call_operand.vmem [shape: f32[8,256], index: 2, kind: input, shape index: {}]   ;;  %s644_s3 = inlined_call_operand.hbm [shape: f32[8,256], index: 3, kind: output, shape index: {}]  }
   0x1   :  { %10 = vsyncpa [#allocation3 + $0x1], 0  ;;  %s538_s12 = smov 0   ;;  %s540_s13 = smov 0  }
   0x2   :  { %s542_s14 = smov 0   ;;  %s544_s15 = smov 0  }
   0x3   :  { %s546_s16 = smov 0   ;;  %s548_s17 = smov 0  }
   0x4 LB: > { %s367_s18 = sadd.s32 4294967295, %s515_s17   ;;  %s368_s19 = sadd.s32 4294967294, %s515_s17   ;;  %s515_s17 = sphi %s548_s17, %s16_s17   ;;  %s511_s16 = sphi %s546_s16, %s651_s16   ;;  %s507_s15 = sphi %s544_s15, %s650_s15   ;;  %s503_s14 = sphi %s542_s14, %s649_s14   ;;  %s499_s13 = sphi %s540_s13, %s648_s13   ;;  %s495_s12 = sphi %s538_s12, %s647_s12  }
   0x5   : > { %s25_s20 = sadd.s32 1, %s511_s16  ;;  %s117_s21 = sadd.s32 1, %s503_s14 }
   0x6   : > { %p26_p0 = scmp.ge.s32.totalorder %s25_s20, 2  ;;  %p127_p1 = scmp.ne.s32.totalorder %s503_s14, %s499_s13 }
   0x7   : > { %p128_p2 = scmp.eq.s32.totalorder %s367_s18, 1  ;;  %p133_p3 = scmp.ne.s32.totalorder %s499_s13, %s495_s12 }
   0x8   : > { %s653_s20 = smov (%p26_p0, %s25_s20), 0  ;;  %p134_p5 = scmp.eq.s32.totalorder %s368_s19, 1 }
   0x9   : > { %p578_p4 = por %p128_p2, %p127_p1  ;;  %s113_s23 = ssub.s32 %s511_s16, %s653_s20 }
   0xa   : > { %p373_p6 = scmp.ge.s32.totalorder %s515_s17, 1  ;;  %p115_p7 = scmp.eq.s32.totalorder %s113_s23, 0 }
   0xb   : > { %p585_p8 = por %p134_p5, %p133_p3  ;;  %p177_p9 = scmp.lt.s32.totalorder %s515_s17, 3 }
   0xc   : > { %s591_s25 = scalar_select %p115_p7, %s503_s14, %s117_s21  }
   0xd   : > { %p178_p10 = pnand %p373_p6, %p177_p9 }
   0xe   : > { %p222_p11 = scmp.lt.s32.totalorder (!%p178_p10), %s507_s15, 1  ;;  %s209_s4 = sand.u32 (!%p178_p10), 1, %s499_s13  }
   0xf   : > { %181 = sbr.rel (%p178_p10) target bundleno = 150 (0x96), region = 32  ;;  %s374_s6 = sshll.u32 (!%p178_p10), %s209_s4, 3 }
  0x10   : > { %s377_s7 = sshll.u32 (!%p178_p10), %s507_s15, 3  ;;  %s211_s21 = scalar_lea.vmem (!%p178_p10), [#allocation2], %s374_s6 }
  0x11   : > { %s257_s19 = scalar_lea.hbm (!%p178_p10), %s644_s3, %s377_s7  ;;  %s259_s23 = sshll.u32 (!%p178_p10), %s211_s21, 4  ;;  %s260_s23 = int_to_ptr.vmem [resolvable:$true] %s259_s23 }
  0x12   : > { %s261_s26 = sshll.u32 (!%p178_p10), %s257_s19, 4  ;;  %s262_s26 = int_to_ptr.hbm [resolvable:$true] %s261_s26 }
  0x13   : > { %s451_s27 = sshra.s32 (!%p178_p10), %s262_s26, 4  ;;  %s452_s27 = int_to_ptr.hbm [resolvable:$true] %s451_s27 }
  0x14   : > { %v228_v0 = vld [vmem:[%s641_s0] sm:$0xff]  ;;  %v517_v1 = vmov 0   ;;  %s223_s30 = scalar_select %p222_p11, %s507_s15, 1 }
  0x15   : > { %436 = vset.pattern.permute.xlu0 %v517_v1  ;;  %v229_v2 = vld [vmem:[%s642_s1] sm:$0xff]  ;;  %s245_s15 = scalar_lea.sflag [#allocation3], %s209_s4  ;;  %s453_s28 = scalar_lea.hbm %s452_s27, 8 }
  0x16   : > { %233 = vperm.xlu0 %436, %v228_v0   ;;  %s375_s5 = sshll.u32 %s223_s30, 3  ;;  %p454_p12 = scmp.ne.s32.totalorder %s452_s27, %s453_s28 }
  0x17   : > { %s227_s10 = scalar_lea.vmem %s643_s2, %s375_s5  ;;  %s457_s5 = scalar_lea.hbm %s644_s3, 16 }
  0x18   : > { %v230_v4 = vld [vmem:[%s227_s10] sm:$0xff]  ;;  %p455_p13 = pnand %p454_p12, %p578_p4  ;;  %p458_p1 = scmp.lt.s32.totalorder %s452_s27, %s644_s3 }
  0x19   : > { %p459_p2 = scmp.lt.s32.totalorder %s457_s5, %s453_s28 }
  0x1a   : > { %p456_p0 = pneg %p455_p13 }
  0x1b   : > { %p460_p3 = por %p459_p2, %p458_p1 }
  0x1d   : > { %p461_p5 = pnand %p460_p3, %p456_p0 }
  0x1e   : > { %239 = vperm.xlu0 %436, %v229_v2  }
  0x88   : > { %v234_v3 = vpop.permute.xlu0 %233 }
  0x89   : > { %v236_v5 = vmul.f32 %v234_v3, %v230_v4 }
  0x90   : > { %v240_v6 = vpop.permute.xlu0 %239 }
  0x91   : > { %v242_v7 = vadd.f32 %v240_v6, %v236_v5 }
  0x93   : > { %243 = vst [vmem:[%s211_s21] sm:$0xff] %v242_v7 }
  0x94   : > { %464 = shalt.err (!%p461_p5)
}
  0x95   : > { %380 = dma.vmem_to_hbm [thread:$0]  (%p578_p4), %s260_s23, 128, %s262_s26, %s245_s15  }
  0x96 PF: > { %p386_p6 = scmp.ge.s32.totalorder %s515_s17, 2  ;;  %s273_s4 = sand.u32 1, %s495_s12  }
  0x97   : > { %s274_s8 = scalar_lea.sflag [#allocation3], %s273_s4 }
  0x98   : > { %p383_p7 = pnand %p386_p6, %p585_p8 }
  0x9a   : > { %p384_p9 = pneg %p383_p7 }
  0x9c   : > { %490 = dma.done.wait (%p384_p9), %s274_s8, 128  }
  0x9d   : > { %492 = vsyncadd (%p384_p9), %s274_s8, 4294967168  ;;  %s16_s17 = sadd.s32 1, %s515_s17   ;;  %s647_s12 = smov %s499_s13 }
  0x9e   : > { %p13_p10 = scmp.ge.s32.totalorder %s16_s17, 4   ;;  %s648_s13 = smov %s503_s14 }
  0x9f   : > { %s649_s14 = smov %s591_s25  ;;  %s650_s15 = smov %s511_s16 }
  0xa0   : > { %s651_s16 = smov %s653_s20  ;;  %15 = sbr.rel (!%p13_p10) target bundleno = 4 (0x4), region = 73 }
  0xa5   :  { %280 = vsyncpa [#allocation3], 1 }
  0xa6   :  { %282 = vsyncpa [#allocation3 + $0x1], 1 }

</bundles_post_ra>
